<compile_context>
chip_gen: v5e
topology: v5e:2x2
jax: 0.10.0
libtpu: 0.0.40
codegen_flags: <defaults>
</compile_context>

<pallas_src>
import functools

import jax
import jax.numpy as jnp
from jax.experimental import pallas as pl
from jax.experimental.pallas import tpu as pltpu


def _round_up(x, m):
    return ((x + m - 1) // m) * m


def _ffn_kernel_fused(x_ref, w1_ref, b1_ref, w2_ref, b2_ref, o_ref, *,
                      compute_dtype):
    """Whole d_ff resident (n_k == 1): no accumulator scratch needed."""
    x = x_ref[...].astype(compute_dtype)
    h = jnp.dot(x, w1_ref[...], preferred_element_type=jnp.float32)
    h = jnp.maximum(h + b1_ref[...], 0.0)
    y = jnp.dot(h.astype(compute_dtype), w2_ref[...],
                preferred_element_type=jnp.float32)
    # TODO(synk): nn.Dropout is stochastic at train time; this kernel implements
    #             eval-mode semantics (dropout == identity).
    o_ref[...] = (y + b2_ref[...]).astype(o_ref.dtype)


def _ffn_kernel_ktiled(x_ref, w1_ref, b1_ref, w2_ref, b2_ref, o_ref, acc_ref, *,
                       compute_dtype):
    """One (row-tile i, d_ff-tile k) step; f32 VMEM accumulator over k."""
    k = pl.program_id(1)

    @pl.when(k == 0)
    def _():
        acc_ref[...] = jnp.zeros_like(acc_ref)

    x = x_ref[...].astype(compute_dtype)
    h = jnp.dot(x, w1_ref[...], preferred_element_type=jnp.float32)
    h = jnp.maximum(h + b1_ref[...], 0.0)
    acc_ref[...] += jnp.dot(h.astype(compute_dtype), w2_ref[...],
                            preferred_element_type=jnp.float32)

    @pl.when(k == pl.num_programs(1) - 1)
    def _():
        o_ref[...] = (acc_ref[...] + b2_ref[...]).astype(o_ref.dtype)


def positionwise_ffn(x, w1, b1, w2, b2, *, tm=None, tk=None,
                     compute_dtype=jnp.bfloat16, out_dtype=None):
    """x: (..., d_model). w1: (d_model, d_ff), w2: (d_ff, d_model).

    compute_dtype: dtype fed to the MXU (default bf16; native on v5e/v6e/v7x).
    Bias add, ReLU and all accumulation stay in float32.
    """
    orig_shape = x.shape
    d_model = orig_shape[-1]
    d_ff = w1.shape[1]
    assert w1.shape == (d_model, d_ff)
    assert b1.shape == (d_ff,)
    assert w2.shape == (d_ff, d_model)
    assert b2.shape == (d_model,)

    if out_dtype is None:
        out_dtype = x.dtype
    compute_dtype = jnp.dtype(compute_dtype)
    x_bytes = jnp.dtype(x.dtype).itemsize
    c_bytes = compute_dtype.itemsize
    o_bytes = jnp.dtype(out_dtype).itemsize

    # x keeps its own dtype; the cast to compute_dtype happens per-tile inside
    # the kernel (avoids a full extra HBM read+write pass over x).
    x2 = x.reshape(-1, d_model)
    n = x2.shape[0]

    # Rely on partial last blocks + masked stores instead of a wrapper pad;
    # only inputs with fewer than 8 rows get a (tiny, cheap) pad so the row
    # block never exceeds the array extent.
    n_work = n
    if n < 8:
        x2 = jnp.pad(x2, ((0, 8 - n), (0, 0)))
        n_work = 8

    # ---- VMEM budget (per TensorCore) -------------------------------------
    try:
        phys = pltpu.get_tpu_info().vmem_capacity_bytes
    except Exception:  # conservative fallback = v7x per-TC capacity
        phys = 64 * 1024 * 1024
    tile_budget = int(0.6 * phys)      # what tile sizing is solved against
    weight_budget = phys // 4          # ~16 MiB on v7x, ~32 MiB on v5e/v6e

    # ---- d_ff (K) tiling ----------------------------------------------------
    if tk is not None:
        tk_eff = max(128, min(_round_up(tk, 128), _round_up(d_ff, 128)))
    elif 2 * d_model * d_ff * c_bytes <= weight_budget:
        tk_eff = d_ff                  # weights resident: fetched from HBM once
    else:
        tk_eff = min(512, _round_up(d_ff, 256))

    d_ff_pad = d_ff if tk_eff == d_ff else _round_up(d_ff, tk_eff)
    n_k = d_ff_pad // tk_eff

    # One-time weight prep: cast + (optional) zero-pad of d_ff.  Zero-padded
    # columns/rows are mathematically inert: relu(x@0 + 0) @ W2_pad == 0.
    w1c = w1.astype(compute_dtype)
    w2c = w2.astype(compute_dtype)
    b1f = b1.astype(jnp.float32)
    if d_ff_pad != d_ff:
        w1c = jnp.pad(w1c, ((0, 0), (0, d_ff_pad - d_ff)))
        b1f = jnp.pad(b1f, ((0, d_ff_pad - d_ff),))
        w2c = jnp.pad(w2c, ((0, d_ff_pad - d_ff), (0, 0)))
    b1_2d = b1f.reshape(1, d_ff_pad)
    b2_2d = b2.astype(jnp.float32).reshape(1, d_model)

    # ---- row (M) tiling -----------------------------------------------------
    w_bufs = 1 if n_k == 1 else 2
    fixed_bytes = w_bufs * 2 * d_model * tk_eff * c_bytes          # W1 + W2 tiles
    fixed_bytes += w_bufs * 8 * _round_up(tk_eff, 128) * 4         # b1 (padded)
    fixed_bytes += 8 * _round_up(d_model, 128) * 4                 # b2 (padded)
    per_row_bytes = (2 * d_model * x_bytes                         # x tile (2 bufs)
                     + 2 * d_model * o_bytes                       # out tile (2 bufs)
                     + tk_eff * 4 + tk_eff * c_bytes               # h (f32 + cast)
                     + d_model * 4)                                # acc / y temp
    tm_vmem_cap = max(8, (tile_budget - fixed_bytes) // per_row_bytes)

    tm_desired = 1024 if tm is None else tm
    tm_eff = min(tm_desired, n_work, tm_vmem_cap)
    if tm is None and n_work >= 512:
        # keep at least 2 row tiles so the "parallel" axis can shard across
        # both v7x TensorCores
        tm_eff = min(tm_eff, _round_up((n_work + 1) // 2, 256))
    if tm_eff >= 256:
        tm_eff = (tm_eff // 256) * 256   # 256-aligned for the v6e/v7x MXU
    else:
        tm_eff = max(8, (tm_eff // 8) * 8)
    n_m = -(-n_work // tm_eff)           # cdiv; last block may be partial

    est_vmem = fixed_bytes + tm_eff * per_row_bytes
    vmem_limit = int(min(0.9 * phys, max(2 * est_vmem, 32 * 1024 * 1024)))

    out_shape = jax.ShapeDtypeStruct((n_work, d_model), out_dtype)

    if n_k == 1:
        kernel = functools.partial(_ffn_kernel_fused, compute_dtype=compute_dtype)
        grid_spec = pltpu.PrefetchScalarGridSpec(
            num_scalar_prefetch=0,
            grid=(n_m,),
            in_specs=[
                pl.BlockSpec((tm_eff, d_model), lambda i: (i, 0)),      # x
                pl.BlockSpec((d_model, d_ff_pad), lambda i: (0, 0),
                             pipeline_mode=pl.Buffered(1)),             # W1
                pl.BlockSpec((1, d_ff_pad), lambda i: (0, 0),
                             pipeline_mode=pl.Buffered(1)),             # b1
                pl.BlockSpec((d_ff_pad, d_model), lambda i: (0, 0),
                             pipeline_mode=pl.Buffered(1)),             # W2
                pl.BlockSpec((1, d_model), lambda i: (0, 0),
                             pipeline_mode=pl.Buffered(1)),             # b2
            ],
            out_specs=pl.BlockSpec((tm_eff, d_model), lambda i: (i, 0)),
            scratch_shapes=[],
        )
        dim_sems = ("parallel",)
    else:
        kernel = functools.partial(_ffn_kernel_ktiled, compute_dtype=compute_dtype)
        grid_spec = pltpu.PrefetchScalarGridSpec(
            num_scalar_prefetch=0,
            grid=(n_m, n_k),
            in_specs=[
                pl.BlockSpec((tm_eff, d_model), lambda i, k: (i, 0)),   # x
                pl.BlockSpec((d_model, tk_eff), lambda i, k: (0, k)),   # W1
                pl.BlockSpec((1, tk_eff), lambda i, k: (0, k)),         # b1
                pl.BlockSpec((tk_eff, d_model), lambda i, k: (k, 0)),   # W2
                pl.BlockSpec((1, d_model), lambda i, k: (0, 0),
                             pipeline_mode=pl.Buffered(1)),             # b2
            ],
            out_specs=pl.BlockSpec((tm_eff, d_model), lambda i, k: (i, 0)),
            scratch_shapes=[pltpu.VMEM((tm_eff, d_model), jnp.float32)],
        )
        dim_sems = ("parallel", "arbitrary")

    out = pl.pallas_call(
        kernel,
        out_shape=out_shape,
        grid_spec=grid_spec,
        compiler_params=pltpu.CompilerParams(
            dimension_semantics=dim_sems,
            vmem_limit_bytes=vmem_limit,
        ),
    )(x2, w1c, b1_2d, w2c, b2_2d)

    if n_work != n:
        out = out[:n]
    return out.reshape(orig_shape)


if __name__ == "__main__":
    # Lane-dense d_model (>=128) so output stores are unmasked full-lane vst.
    batch, seq, d_model, d_ff = 2, 8, 128, 256

    key = jax.random.PRNGKey(0)
    kx, kw1, kb1, kw2, kb2 = jax.random.split(key, 5)

    x = jax.random.normal(kx, (batch, seq, d_model), dtype=jnp.float32)
    # nn.Linear(d_model, d_ff): torch weight is (d_ff, d_model), bias (d_ff,).
    # The kernel takes the transposed weight (in_features, out_features).
    w1 = jax.random.normal(kw1, (d_model, d_ff), dtype=jnp.float32) * 0.1
    b1 = jax.random.normal(kb1, (d_ff,), dtype=jnp.float32) * 0.1
    w2 = jax.random.normal(kw2, (d_ff, d_model), dtype=jnp.float32) * 0.1
    b2 = jax.random.normal(kb2, (d_model,), dtype=jnp.float32) * 0.1

    ref = jnp.maximum(x @ w1 + b1, 0.0) @ w2 + b2

    # 1) Default path: bf16 MXU inputs, f32 accumulation, weights resident.
    y = positionwise_ffn(x, w1, b1, w2, b2)
    jax.block_until_ready(y)
    assert y.shape == x.shape
    assert jnp.allclose(y, ref, atol=1e-1, rtol=1e-1)

    # 2) All-f32 path (tight tolerance), single fused kernel, n_k == 1.
    y_f32 = positionwise_ffn(x, w1, b1, w2, b2, compute_dtype=jnp.float32)
    jax.block_until_ready(y_f32)
    assert jnp.allclose(y_f32, ref, atol=1e-5, rtol=1e-5)

    # 3) Forced K-tiling: multi-k grid + f32 VMEM accumulator.
    y_kt = positionwise_ffn(x, w1, b1, w2, b2, tm=8, tk=128,
                            compute_dtype=jnp.float32)
    jax.block_until_ready(y_kt)
    assert jnp.allclose(y_kt, ref, atol=1e-5, rtol=1e-5)

    # 4) Row count not a multiple of the tile: partial last block + masked
    #    store (no wrapper-side jnp.pad copy of x).
    y_tail = positionwise_ffn(x[:, :5], w1, b1, w2, b2,
                              compute_dtype=jnp.float32)
    jax.block_until_ready(y_tail)
    assert jnp.allclose(y_tail, ref[:, :5], atol=1e-5, rtol=1e-5)

    # 5) d_ff not a multiple of the K tile: zero-padded d_ff path.
    d_ff_odd = 192
    kw1b, kb1b, kw2b = jax.random.split(jax.random.PRNGKey(1), 3)
    w1b = jax.random.normal(kw1b, (d_model, d_ff_odd), dtype=jnp.float32) * 0.1
    b1b = jax.random.normal(kb1b, (d_ff_odd,), dtype=jnp.float32) * 0.1
    w2b = jax.random.normal(kw2b, (d_ff_odd, d_model), dtype=jnp.float32) * 0.1
    ref_b = jnp.maximum(x @ w1b + b1b, 0.0) @ w2b + b2
    y_b = positionwise_ffn(x, w1b, b1b, w2b, b2, tk=128,
                           compute_dtype=jnp.float32)
    jax.block_until_ready(y_b)
    assert jnp.allclose(y_b, ref_b, atol=1e-5, rtol=1e-5)

    print("KERNEL_OK")
</pallas_src>

<mosaic_0001>
module attributes {stable_mosaic.version = 11 : i64} {
  func.func @_ffn_kernel_fused(%arg0: i32, %arg1: memref<16x128xf32, #tpu.memory_space<vmem>>, %arg2: memref<128x256xbf16, #tpu.memory_space<vmem>>, %arg3: memref<1x256xf32, #tpu.memory_space<vmem>>, %arg4: memref<256x128xbf16, #tpu.memory_space<vmem>>, %arg5: memref<1x128xf32, #tpu.memory_space<vmem>>, %arg6: memref<16x128xf32, #tpu.memory_space<vmem>>) attributes {dimension_semantics = [#tpu.dimension_semantics<parallel>], iteration_bounds = array<i64: 1>, scalar_prefetch = 0 : i64, scratch_operands = 0 : i64, tpu.core_type = #tpu.core_type<tc>, window_params = [{transform_indices = @transform_0, window_bounds = array<i64: 16, 128>}, {pipeline_mode = #tpu.pipeline_mode<synchronous>, transform_indices = @transform_1, window_bounds = array<i64: 128, 256>}, {pipeline_mode = #tpu.pipeline_mode<synchronous>, transform_indices = @transform_2, window_bounds = array<i64: 1, 256>}, {pipeline_mode = #tpu.pipeline_mode<synchronous>, transform_indices = @transform_3, window_bounds = array<i64: 256, 128>}, {pipeline_mode = #tpu.pipeline_mode<synchronous>, transform_indices = @transform_4, window_bounds = array<i64: 1, 128>}, {transform_indices = @transform_5, window_bounds = array<i64: 16, 128>}]} {
    %c0 = arith.constant 0 : index
    %c0_0 = arith.constant 0 : index
    %0 = vector.load %arg1[%c0, %c0_0] : memref<16x128xf32, #tpu.memory_space<vmem>>, vector<16x128xf32>
    %1 = arith.truncf %0 : vector<16x128xf32> to vector<16x128xbf16>
    %c0_1 = arith.constant 0 : index
    %c0_2 = arith.constant 0 : index
    %2 = vector.load %arg2[%c0_1, %c0_2] : memref<128x256xbf16, #tpu.memory_space<vmem>>, vector<128x256xbf16>
    %cst = arith.constant dense<0.000000e+00> : vector<16x256xf32>
    %3 = tpu.matmul %1, %2, %cst {dimension_numbers = #tpu.dot_dimension_numbers<[1], [0], [0], [1], [0, 0, 1, 1], [], []>} : vector<16x128xbf16>, vector<128x256xbf16>, vector<16x256xf32> -> vector<16x256xf32>
    %c0_3 = arith.constant 0 : index
    %c0_4 = arith.constant 0 : index
    %4 = vector.load %arg3[%c0_3, %c0_4] : memref<1x256xf32, #tpu.memory_space<vmem>>, vector<1x256xf32>
    %5 = vector.broadcast %4 : vector<1x256xf32> to vector<16x256xf32>
    %6 = arith.addf %3, %5 : vector<16x256xf32>
    %cst_5 = arith.constant 0.000000e+00 : f32
    %7 = vector.broadcast %cst_5 : f32 to vector<16x256xf32>
    %8 = arith.maximumf %6, %7 : vector<16x256xf32>
    %9 = arith.truncf %8 : vector<16x256xf32> to vector<16x256xbf16>
    %c0_6 = arith.constant 0 : index
    %c0_7 = arith.constant 0 : index
    %10 = vector.load %arg4[%c0_6, %c0_7] : memref<256x128xbf16, #tpu.memory_space<vmem>>, vector<256x128xbf16>
    %cst_8 = arith.constant dense<0.000000e+00> : vector<16x128xf32>
    %11 = tpu.matmul %9, %10, %cst_8 {dimension_numbers = #tpu.dot_dimension_numbers<[1], [0], [0], [1], [0, 0, 1, 1], [], []>} : vector<16x256xbf16>, vector<256x128xbf16>, vector<16x128xf32> -> vector<16x128xf32>
    %c0_9 = arith.constant 0 : index
    %c0_10 = arith.constant 0 : index
    %12 = vector.load %arg5[%c0_9, %c0_10] : memref<1x128xf32, #tpu.memory_space<vmem>>, vector<1x128xf32>
    %13 = vector.broadcast %12 : vector<1x128xf32> to vector<16x128xf32>
    %14 = arith.addf %11, %13 : vector<16x128xf32>
    %c0_11 = arith.constant 0 : index
    %c0_12 = arith.constant 0 : index
    %15 = vector.load %arg6[%c0_11, %c0_12] : memref<16x128xf32, #tpu.memory_space<vmem>>, vector<16x128xf32>
    tpu.vector_store %arg6[%c0_11, %c0_12], %14 {strides = array<i32>} : memref<16x128xf32, #tpu.memory_space<vmem>>, vector<16x128xf32>,
    return
  }
  func.func @transform_0(%arg0: i32) -> (i32, i32) {
    %c0_i32 = arith.constant 0 : i32
    %c0_i32_0 = arith.constant 0 : i32
    return %arg0, %c0_i32 : i32, i32
  }
  func.func @transform_1(%arg0: i32) -> (i32, i32) {
    %c0_i32 = arith.constant 0 : i32
    %c0_i32_0 = arith.constant 0 : i32
    %c0_i32_1 = arith.constant 0 : i32
    return %c0_i32, %c0_i32_0 : i32, i32
  }
  func.func @transform_2(%arg0: i32) -> (i32, i32) {
    %c0_i32 = arith.constant 0 : i32
    %c0_i32_0 = arith.constant 0 : i32
    %c0_i32_1 = arith.constant 0 : i32
    return %c0_i32, %c0_i32_0 : i32, i32
  }
  func.func @transform_3(%arg0: i32) -> (i32, i32) {
    %c0_i32 = arith.constant 0 : i32
    %c0_i32_0 = arith.constant 0 : i32
    %c0_i32_1 = arith.constant 0 : i32
    return %c0_i32, %c0_i32_0 : i32, i32
  }
  func.func @transform_4(%arg0: i32) -> (i32, i32) {
    %c0_i32 = arith.constant 0 : i32
    %c0_i32_0 = arith.constant 0 : i32
    %c0_i32_1 = arith.constant 0 : i32
    return %c0_i32, %c0_i32_0 : i32, i32
  }
  func.func @transform_5(%arg0: i32) -> (i32, i32) {
    %c0_i32 = arith.constant 0 : i32
    %c0_i32_0 = arith.constant 0 : i32
    return %arg0, %c0_i32 : i32, i32
  }
}

</mosaic_0001>

<bundles_post_ra>
// kernel: tpu_custom_call.1
= control target key start
LH: loop header
LB: loop body
LE: loop exit
PB: predicated region body
PF: predicated region fallthrough
CT: control target
= control target key end

     0   :  { %10 = vsyncpa [#allocation3], 0  ;;  %s768_s0 = inlined_call_operand.hbm [shape: f32[16,128], index: 0, kind: input, shape index: {}]   ;;  %s769_s1 = inlined_call_operand.hbm [shape: bf16[128,256], index: 1, kind: input, shape index: {}]   ;;  %s770_s2 = inlined_call_operand.hbm [shape: f32[1,256], index: 2, kind: input, shape index: {}]   ;;  %s771_s3 = inlined_call_operand.hbm [shape: bf16[256,128], index: 3, kind: input, shape index: {}]   ;;  %s772_s4 = inlined_call_operand.vmem [shape: f32[1,128], index: 4, kind: input, shape index: {}]   ;;  %s773_s5 = inlined_call_operand.hbm [shape: f32[16,128], index: 5, kind: output, shape index: {}]  }
   0x1   :  { %11 = vsyncpa [#allocation6], 0 }
   0x2   :  { %12 = vsyncpa [#allocation9], 0 }
   0x3   :  { %13 = vsyncpa [#allocation4], 0  ;;  %s31_s20 = sshll.u32 %s769_s1, 4  ;;  %s702_s21 = smov [#allocation5]   ;;  %s32_s20 = int_to_ptr.hbm [resolvable:$true] %s31_s20 }
   0x4   :  { %s33_s22 = sshll.u32 %s702_s21, 4  ;;  %s18_s25 = sshll.u32 %s768_s0, 4  ;;  %s34_s22 = int_to_ptr.vmem [resolvable:$true] %s33_s22  ;;  %s19_s25 = int_to_ptr.hbm [resolvable:$true] %s18_s25 }
   0x5   :  { %s703_s26 = smov 128   ;;  %s704_s27 = smov 8  }
   0x6   :  { %39 = dma.hbm_to_vmem [thread:$0]  %s32_s20, 2048, %s34_s22, [#allocation6], %s703_s26, %s703_s26, %s704_s27  }
   0x7   :  { %s705_s28 = smov [#allocation2]   ;;  %s45_s1 = sshll.u32 %s770_s2, 4  ;;  %s46_s1 = int_to_ptr.hbm [resolvable:$true] %s45_s1 }
   0x8   :  { %s20_s29 = sshll.u32 %s705_s28, 4  ;;  %s55_s8 = sshll.u32 %s771_s3, 4  ;;  %s21_s29 = int_to_ptr.vmem [resolvable:$true] %s20_s29  ;;  %s56_s8 = int_to_ptr.hbm [resolvable:$true] %s55_s8 }
   0x9   :  { %26 = dma.hbm_to_vmem [thread:$0]  %s19_s25, 256, %s21_s29, [#allocation3], %s703_s26, %s703_s26, %s704_s27  }
   0xa   :  { %s706_s9 = smov [#allocation7]   ;;  %s707_s11 = smov [#allocation8]  }
   0xb   :  { %s47_s10 = sshll.u32 %s706_s9, 4  ;;  %s57_s12 = sshll.u32 %s707_s11, 4  ;;  %s48_s10 = int_to_ptr.vmem [resolvable:$true] %s47_s10  ;;  %s58_s12 = int_to_ptr.vmem [resolvable:$true] %s57_s12 }
   0xc   :  { %50 = dma.hbm_to_vmem [thread:$0]  %s46_s1, 32, %s48_s10, [#allocation6]  }
   0xd   :  { %s708_s13 = smov 64   ;;  %s709_s2 = smov 4  }
   0xe   :  { %63 = dma.hbm_to_vmem [thread:$0]  %s56_s8, 2048, %s58_s12, [#allocation9], %s708_s13, %s708_s13, %s709_s2  }
   0xf   :  { %694 = dma.done.wait [#allocation3], 256  }
  0x10   :  { %695 = vsyncadd [#allocation3], 4294967040 }
  0x11   :  { %696 = dma.done.wait [#allocation6], 2080  }
  0x12   :  { %697 = vsyncadd [#allocation6], 4294965216 }
  0x13   :  { %698 = dma.done.wait [#allocation9], 2048  }
  0x14   :  { %699 = vsyncadd [#allocation9], 4294965248  ;;  %v462_v0 = vld [vmem:[#allocation5 + $0x70] sm:$0xf]  ;;  %v547_v1 = vld [vmem:[#allocation5 + $0x74] sm:$0xf0] }
  0x15   :  { %v546_v2 = vld [vmem:[#allocation5 + $0x74] sm:$0xf]  ;;  %v463_v3 = vor.u32 %v547_v1, %v462_v0  ;;  %v464_v4 = vld [vmem:[#allocation5 + $0x78] sm:$0xf0]  ;;  %v454_v5 = vld [vmem:[#allocation5 + $0x60] sm:$0xf] }
  0x16   :  { %v545_v6 = vld [vmem:[#allocation5 + $0x64] sm:$0xf0]  ;;  %v467_v7 = vor.u32 %v546_v2, %v464_v4  ;;  %v544_v8 = vld [vmem:[#allocation5 + $0x64] sm:$0xf]  ;;  %v456_v9 = vld [vmem:[#allocation5 + $0x68] sm:$0xf0] }
  0x17   :  { %187 = vmatpush.bf16.msra.mxu0 %v463_v3  ;;  %v455_v10 = vor.u32 %v545_v6, %v454_v5  ;;  %v459_v11 = vor.u32 %v544_v8, %v456_v9  ;;  %v446_v12 = vld [vmem:[#allocation5 + $0x50] sm:$0xf]  ;;  %v543_v13 = vld [vmem:[#allocation5 + $0x54] sm:$0xf0]  ;;  %v542_v14 = vld [vmem:[#allocation5 + $0x54] sm:$0xf] }
  0x18   :  { %201 = vmatpush.bf16.msra.mxu1 %v467_v7  ;;  %v448_v15 = vld [vmem:[#allocation5 + $0x58] sm:$0xf0]  ;;  %v447_v16 = vor.u32 %v543_v13, %v446_v12  ;;  %v438_v18 = vld [vmem:[#allocation5 + $0x40] sm:$0xf]  ;;  %v541_v19 = vld [vmem:[#allocation5 + $0x44] sm:$0xf0] }
  0x19   :  { %v451_v17 = vor.u32 %v542_v14, %v448_v15  ;;  %v540_v20 = vld [vmem:[#allocation5 + $0x44] sm:$0xf]  ;;  %v440_v21 = vld [vmem:[#allocation5 + $0x48] sm:$0xf0]  ;;  %v439_v22 = vor.u32 %v541_v19, %v438_v18  ;;  %v555_v23 = vld [vmem:[#allocation8 + $0x38] sm:$0xff]  ;;  %s710_s15 = smov [#allocation10]  }
  0x1a   :  { %v563_v24 = vld [vmem:[#allocation8 + $0x78] sm:$0xff]  ;;  %v443_v25 = vor.u32 %v540_v20, %v440_v21  ;;  %v430_v26 = vld [vmem:[#allocation5 + $0x30] sm:$0xf]  ;;  %v538_v28 = vld [vmem:[#allocation5 + $0x34] sm:$0xf]  ;;  %353 = vmatpush.bf16.msra.mxu2 %v555_v23  ;;  %s387_s16 = sshll.u32 %s710_s15, 4  ;;  %s388_s16 = int_to_ptr.vmem [resolvable:$true] %s387_s16 }
  0x1b   :  { %188 = vmatpush.bf16.msra.mxu0 %v455_v10  ;;  %v539_v27 = vld [vmem:[#allocation5 + $0x34] sm:$0xf0]  ;;  %v432_v29 = vld [vmem:[#allocation5 + $0x38] sm:$0xf0]  ;;  %367 = vmatpush.bf16.msra.mxu3 %v563_v24  ;;  %v422_v34 = vld [vmem:[#allocation5 + $0x20] sm:$0xf] }
  0x1c   :  { %202 = vmatpush.bf16.msra.mxu1 %v459_v11  ;;  %v554_v30 = vld [vmem:[#allocation8 + $0x30] sm:$0xff]  ;;  %v431_v32 = vor.u32 %v539_v27, %v430_v26  ;;  %v435_v33 = vor.u32 %v538_v28, %v432_v29  ;;  %v537_v35 = vld [vmem:[#allocation5 + $0x24] sm:$0xf0]  ;;  %v536_v36 = vld [vmem:[#allocation5 + $0x24] sm:$0xf]  ;;  %s389_s19 = sshll.u32 %s773_s5, 4  ;;  %s390_s19 = int_to_ptr.hbm [resolvable:$true] %s389_s19 }
  0x1d   :  { %v562_v31 = vld [vmem:[#allocation8 + $0x70] sm:$0xff]  ;;  %v424_v37 = vld [vmem:[#allocation5 + $0x28] sm:$0xf0]  ;;  %v423_v40 = vor.u32 %v537_v35, %v422_v34  ;;  %v416_v45 = vld [vmem:[#allocation5 + $0x18] sm:$0xf0] }
  0x1e   :  { %354 = vmatpush.bf16.msra.mxu2 %v554_v30  ;;  %v553_v38 = vld [vmem:[#allocation8 + $0x28] sm:$0xff]  ;;  %v427_v41 = vor.u32 %v536_v36, %v424_v37  ;;  %v535_v43 = vld [vmem:[#allocation5 + $0x14] sm:$0xf0]  ;;  %v534_v44 = vld [vmem:[#allocation5 + $0x14] sm:$0xf] }
  0x1f   :  { %189 = vmatpush.bf16.msra.mxu0 %v447_v16  ;;  %368 = vmatpush.bf16.msra.mxu3 %v562_v31  ;;  %v561_v39 = vld [vmem:[#allocation8 + $0x68] sm:$0xff]  ;;  %v552_v46 = vld [vmem:[#allocation8 + $0x20] sm:$0xff]  ;;  %v419_v49 = vor.u32 %v534_v44, %v416_v45  ;;  %v83_v56 = vld [vmem:[#allocation2 + $0x8] sm:$0xff] }
  0x20   :  { %203 = vmatpush.bf16.msra.mxu1 %v451_v17  ;;  %v414_v42 = vld [vmem:[#allocation5 + $0x10] sm:$0xf]  ;;  %v560_v47 = vld [vmem:[#allocation8 + $0x60] sm:$0xff]  ;;  %v408_v53 = vld [vmem:[#allocation5 + $0x8] sm:$0xf0] }
  0x21   :  { %v415_v48 = vor.u32 %v535_v43, %v414_v42  ;;  %v406_v50 = vld [vmem:[#allocation5] sm:$0xf]  ;;  %v533_v51 = vld [vmem:[#allocation5 + $0x4] sm:$0xf0]  ;;  %v532_v52 = vld [vmem:[#allocation5 + $0x4] sm:$0xf] }
  0x22   :  { %355 = vmatpush.bf16.msra.mxu2 %v553_v38  ;;  %v407_v54 = vor.u32 %v533_v51, %v406_v50  ;;  %v82_v55 = vld [vmem:[#allocation2] sm:$0xff]  ;;  %v411_v57 = vor.u32 %v532_v52, %v408_v53  ;;  %v551_v59 = vld [vmem:[#allocation8 + $0x18] sm:$0xff]  ;;  %v548_v1 = vld [vmem:[#allocation8] sm:$0xff] }
  0x23   :  { %190 = vmatpush.bf16.msra.mxu0 %v439_v22  ;;  %369 = vmatpush.bf16.msra.mxu3 %v561_v39  ;;  %v84_v58 = vpack.c.bf16 %v83_v56, %v82_v55  ;;  %v559_v60 = vld [vmem:[#allocation8 + $0x58] sm:$0xff]  ;;  %v550_v61 = vld [vmem:[#allocation8 + $0x10] sm:$0xff]  ;;  %v549_v63 = vld [vmem:[#allocation8 + $0x8] sm:$0xff] }
  0x24   :  { %204 = vmatpush.bf16.msra.mxu1 %v443_v25  ;;  %v558_v62 = vld [vmem:[#allocation8 + $0x50] sm:$0xff]  ;;  %v557_v0 = vld [vmem:[#allocation8 + $0x48] sm:$0xff]  ;;  %v556_v2 = vld [vmem:[#allocation8 + $0x40] sm:$0xff] }
  0x25   :  { %v101_v3 = vld [vmem:[#allocation7] sm:$0x3]  ;;  %v573_v20 = vld [vmem:[%s772_s4] ss:$0 sm:$0xff] }
  0x26   :  { %356 = vmatpush.bf16.msra.mxu2 %v552_v46  ;;  %v103_v6 = vperm.slane %v101_v3, 0  ;;  %v104_v7 = vperm.slane %v101_v3, 1 }
  0x27   :  { %191 = vmatpush.bf16.msra.mxu0 %v431_v32  ;;  %370 = vmatpush.bf16.msra.mxu3 %v560_v47 }
  0x28   :  { %205 = vmatpush.bf16.msra.mxu1 %v435_v33 }
  0x2a   :  { %357 = vmatpush.bf16.msra.mxu2 %v551_v59 }
  0x2b   :  { %192 = vmatpush.bf16.msra.mxu0 %v423_v40  ;;  %371 = vmatpush.bf16.msra.mxu3 %v559_v60 }
  0x2c   :  { %206 = vmatpush.bf16.msra.mxu1 %v427_v41 }
  0x2e   :  { %358 = vmatpush.bf16.msra.mxu2 %v550_v61 }
  0x2f   :  { %193 = vmatpush.bf16.msra.mxu0 %v415_v48  ;;  %372 = vmatpush.bf16.msra.mxu3 %v558_v62 }
  0x30   :  { %207 = vmatpush.bf16.msra.mxu1 %v419_v49 }
  0x32   :  { %359 = vmatpush.bf16.msra.mxu2 %v549_v63 }
  0x33   :  { %194 = vmatpush.bf16.msra.mxu0 %v407_v54  ;;  %373 = vmatpush.bf16.msra.mxu3 %v557_v0 }
  0x34   :  { %208 = vmatpush.bf16.msra.mxu1 %v411_v57 }
  0x36   :  { %195 = vmatmul.bf16.vlgmr.msra.gmra.mxu0 %v84_v58  ;;  %360 = vmatpush.bf16.msra.mxu2 %v548_v1 }
  0x37   :  { %209 = vmatmul.bf16.vlgmr.msra.gmra.mxu1 %v84_v58  ;;  %374 = vmatpush.bf16.msra.mxu3 %v556_v2 }
  0xb3   :  { %v196_v4 = vpop.f32.mrf.mxu0 }
  0xb4   :  { %v210_v5 = vpop.f32.mrf.mxu1  ;;  %v197_v8 = vadd.f32 %v196_v4, %v103_v6 }
  0xb5   :  { %v211_v9 = vadd.f32 %v210_v5, %v104_v7 }
  0xb6   :  { %v215_v14 = vmax.f32 %v197_v8, 0.0 }
  0xb7   :  { %v216_v16 = vmax.f32 %v211_v9, 0.0 }
  0xbb   :  { %v198_v10 = vpop.f32.mrf.mxu0 }
  0xbc   :  { %v199_v11 = vadd.f32 %v198_v10, %v103_v6  ;;  %v212_v12 = vpop.f32.mrf.mxu1 }
  0xbd   :  { %v213_v13 = vadd.f32 %v212_v12, %v104_v7 }
  0xbe   :  { %v217_v15 = vmax.f32 %v199_v11, 0.0 }
  0xbf   :  { %v218_v17 = vmax.f32 %v213_v13, 0.0 }
  0xc0   :  { %v219_v18 = vpack.c.bf16 %v217_v15, %v215_v14 }
  0xc1   :  { %v220_v19 = vpack.c.bf16 %v218_v17, %v216_v16 }
  0xc2   :  { %361 = vmatmul.bf16.vlgmr.msra.gmra.mxu2 %v219_v18 }
  0xc3   :  { %375 = vmatmul.bf16.vlgmr.msra.gmra.mxu3 %v220_v19 }
 0x145   :  { %v362_v21 = vpop.f32.mrf.mxu2 }
 0x146   :  { %v363_v22 = vadd.f32 %v573_v20, %v362_v21  ;;  %v376_v23 = vpop.f32.mrf.mxu3 }
 0x148   :  { %v377_v24 = vadd.f32 %v376_v23, %v363_v22 }
 0x14a   :  { %381 = vst [vmem:[#allocation10] sm:$0xff] %v377_v24 }
 0x14d   :  { %v364_v25 = vpop.f32.mrf.mxu2 }
 0x14e   :  { %v365_v26 = vadd.f32 %v573_v20, %v364_v25  ;;  %v378_v27 = vpop.f32.mrf.mxu3 }
 0x150   :  { %v379_v28 = vadd.f32 %v378_v27, %v365_v26 }
 0x152   :  { %382 = vst [vmem:[#allocation10 + $0x8] sm:$0xff] %v379_v28 }
 0x153   :  { %395 = dma.vmem_to_hbm [thread:$0]  %s388_s16, 256, %s390_s19, [#allocation4], %s703_s26, %s703_s26, %s704_s27  }
 0x154   :  { %700 = dma.done.wait [#allocation4], 256  }
 0x155   :  { %701 = vsyncadd [#allocation4], 4294967040 }
 0x156   :  { %400 = vsyncpa [#allocation3], 1 }
 0x157   :  { %401 = vsyncpa [#allocation6], 1 }
 0x158   :  { %402 = vsyncpa [#allocation9], 1 }
 0x159   :  { %403 = vsyncpa [#allocation4], 1 }

</bundles_post_ra>
